<compile_context>
chip_gen: v6e
topology: v6e:2x2x1
jax: 0.10.0
libtpu: 0.0.40
codegen_flags: <defaults>
</compile_context>

<pallas_src>
import jax
import jax.numpy as jnp
from jax.experimental import pallas as pl
from jax.experimental.pallas import tpu as pltpu

_NEG_INIT = -1e30  # finite "minus infinity" so online-softmax corrections stay NaN-free


# --------------------------------------------------------------------------- #
# Kernel
# --------------------------------------------------------------------------- #
def _luong_attention_kernel(pq_ref, mask_ref, keys_ref, vals_ref,
                            ctx_ref, alphas_ref,
                            m_ref, l_ref, acc_ref):
    """One (batch-block, src-block) grid step of masked Luong attention.

    pq_ref:    (bb, 1, K)   projected query (query @ W), compute dtype
    mask_ref:  (bb, 1, bs)  f32, 0 = masked
    keys_ref:  (bb, bs, K)  compute dtype
    vals_ref:  (bb, bs, K)  compute dtype
    ctx_ref:   (bb, 1, K)   output, resident across the S axis
    alphas_ref:(bb, 1, S)   output (full S), resident across the S axis
    m/l/acc:   f32 VMEM scratch (running max, running denom, context numerator)
    """
    s_idx = pl.program_id(1)
    n_s = pl.num_programs(1)
    bs = keys_ref.shape[1]
    s_total = alphas_ref.shape[-1]

    @pl.when(s_idx == 0)
    def _init():
        m_ref[...] = jnp.full_like(m_ref, _NEG_INIT)
        l_ref[...] = jnp.zeros_like(l_ref)
        acc_ref[...] = jnp.zeros_like(acc_ref)
        if bs != s_total:  # multi-step S: start from a clean unnormalized-alpha slab
            alphas_ref[...] = jnp.zeros_like(alphas_ref)

    pq = pq_ref[...]                         # (bb, 1, K)
    keys = keys_ref[...]                     # (bb, bs, K)
    mask = mask_ref[...]                     # (bb, 1, bs)

    # scores[b, 0, s] = sum_k pq[b, 0, k] * keys[b, s, k]
    # (reassociated form of query @ proj_keys^T; f32 accumulation on the MXU)
    scores = jnp.einsum("bqk,bsk->bqs", pq, keys,
                        preferred_element_type=jnp.float32)      # (bb, 1, bs) f32
    scores = jnp.where(mask > 0, scores, jnp.float32(-jnp.inf))

    # Online-softmax update (exact softmax when n_s == 1).
    m_prev = m_ref[...]                                           # (bb, 1, 1)
    m_new = jnp.maximum(m_prev, jnp.max(scores, axis=-1, keepdims=True))
    corr = jnp.exp(m_prev - m_new)                                # (bb, 1, 1)
    p = jnp.exp(scores - m_new)                                   # masked -> exactly 0
    l_ref[...] = corr * l_ref[...] + jnp.sum(p, axis=-1, keepdims=True)
    m_ref[...] = m_new

    # Context numerator, accumulated in f32 scratch.
    acc_ref[...] = corr * acc_ref[...] + jnp.einsum(
        "bqs,bsk->bqk", p.astype(vals_ref.dtype), vals_ref[...],
        preferred_element_type=jnp.float32)

    # Store this block's unnormalized probabilities (rescaling older blocks by the
    # running-max correction first).
    if bs == s_total:
        alphas_ref[...] = p
    else:
        alphas_ref[...] = alphas_ref[...] * corr
        start = pl.multiple_of(s_idx * bs, 128)   # bs is a multiple of 128 here
        alphas_ref[:, :, pl.ds(start, bs)] = p

    @pl.when(s_idx == n_s - 1)
    def _finalize():
        # Runs once per row; approx=False keeps sum(alphas)==1 to f32 precision.
        inv_l = pl.reciprocal(l_ref[...], approx=False)           # (bb, 1, 1)
        alphas_ref[...] = alphas_ref[...] * inv_l
        ctx_ref[...] = (acc_ref[...] * inv_l).astype(ctx_ref.dtype)


# --------------------------------------------------------------------------- #
# Block / VMEM sizing (generation-aware)
# --------------------------------------------------------------------------- #
def _tpu_vmem_and_cores():
    """(per-core VMEM bytes, TensorCores per chip), with a safe v7x fallback."""
    vmem = 64 * 1024 * 1024   # conservative default = v7x per-TC VMEM
    cores = 0
    try:
        info = pltpu.get_tpu_info()
        vmem = int(getattr(info, "vmem_capacity_bytes", vmem))
        for name in ("num_cores", "core_count", "tensorcore_count", "num_tensorcores"):
            val = getattr(info, name, None)
            if val:
                cores = int(val)
                break
    except Exception:
        pass
    if cores <= 0:
        # v7x (64 MiB/TC) has 2 TCs; v5e/v6e (128 MiB) have 1.
        cores = 2 if vmem <= 64 * 1024 * 1024 else 1
    return vmem, cores


def _divisors(n):
    return [d for d in range(1, n + 1) if n % d == 0]


def _legal_block_s(S):
    """block_s must be a multiple of 128 (lane dim of the mask block) or S itself."""
    cands = [d for d in _divisors(S) if d % 128 == 0]
    if S not in cands:
        cands.append(S)
    return sorted(set(cands), reverse=True)


def _step_vmem_bytes(bb, bs, S, K, csize):
    stream = 2 * 2 * bb * bs * K * csize          # keys + values, double-buffered
    outs = 2 * bb * (S + K) * 4                   # resident alphas + context blocks
    ins = 2 * bb * (bs * 4 + K * csize)           # mask + projected-query blocks
    scratch = 4 * bb * (K + 8)                    # f32 accumulators
    temps = 96 * bb * bs                          # (bb,1,bs) f32 softmax temps (padded)
    return stream + outs + ins + scratch + temps


def _choose_blocks(B, S, K, csize, budget, cores):
    bbs = sorted(_divisors(B), reverse=True)
    bss = _legal_block_s(S)

    bb_sel, bs_sel = None, None
    # 1) Full-S blocks (single softmax pass) with the largest batch block that fits.
    for bb in bbs:
        if _step_vmem_bytes(bb, S, S, K, csize) <= budget:
            bb_sel, bs_sel = bb, S
            break
    # 2) Otherwise tile the source length (online softmax handles it): keep the
    #    batch block as large as possible, then take the largest legal block_s.
    if bb_sel is None:
        for bb in bbs:
            for bs in bss:
                if bs == S:
                    continue
                if _step_vmem_bytes(bb, bs, S, K, csize) <= budget:
                    bb_sel, bs_sel = bb, bs
                    break
            if bb_sel is not None:
                break
    if bb_sel is None:   # nothing fits cleanly; smallest legal tile as last resort
        bb_sel, bs_sel = 1, bss[-1]

    # 3) Megacore (v7x): the batch axis is the "parallel" one — give it >= 2 blocks
    #    on 2-TC chips.  Single-TC chips keep the largest block (no useless split).
    if cores > 1 and B > 1 and B // bb_sel < 2:
        for bb in bbs:
            if bb < bb_sel and B // bb >= 2 and \
                    _step_vmem_bytes(bb, bs_sel, S, K, csize) <= budget:
                bb_sel = bb
                break
    return bb_sel, bs_sel


# --------------------------------------------------------------------------- #
# Wrapper
# --------------------------------------------------------------------------- #
def luong_attention(query, mask, keys, values, w_key, *,
                    compute_dtype=None, block_b=None, block_s=None):
    """Pallas-backed Luong attention forward.

    query:  (B, 1, H)   mask: (B, 1, S) (0 = masked, >0 = valid)
    keys:   (B, S, K)   values: (B, S, K)
    w_key:  (H, K)      nn.Linear(key_size=K -> hidden_size=H, bias=False) weight
    compute_dtype: dtype used for the streamed keys/values/pq (e.g. jnp.bfloat16
        to halve HBM traffic); accumulation and softmax stay f32.
    returns (context (B, 1, K) in values.dtype, alphas (B, 1, S) f32)
    """
    B, Q, H = query.shape
    Bv, S, K = values.shape
    assert Q == 1 and Bv == B and mask.shape == (B, 1, S)
    assert keys.shape == (B, S, K) and w_key.shape == (H, K)

    cdt = jnp.dtype(compute_dtype) if compute_dtype is not None else jnp.dtype(values.dtype)

    # Hoisted, reassociated projection (one XLA GEMM, B in the M dimension):
    #   scores = q @ (keys @ W^T)^T  ==  (q @ W) @ keys^T
    pq = jnp.einsum("bqh,hk->bqk",
                    query.astype(jnp.float32), w_key.astype(jnp.float32),
                    precision=jax.lax.Precision.HIGHEST).astype(cdt)   # (B, 1, K)

    keys_c = keys.astype(cdt)
    vals_c = values.astype(cdt)
    mask_f = mask.astype(jnp.float32)

    csize = cdt.itemsize
    vmem_cap, cores = _tpu_vmem_and_cores()
    budget = (vmem_cap * 3) // 4          # 48 MiB on v7x, 96 MiB on v5e/v6e

    bb, bs = _choose_blocks(B, S, K, csize, budget, cores)
    if block_b is not None:
        assert B % block_b == 0
        bb = block_b
    if block_s is not None:
        assert S % block_s == 0 and (block_s % 128 == 0 or block_s == S)
        bs = block_s

    grid = (B // bb, S // bs)
    step_bytes = _step_vmem_bytes(bb, bs, S, K, csize)
    vmem_limit = int(min(max(budget, step_bytes + (8 << 20)),
                         max(vmem_cap - (8 << 20), 32 << 20)))

    grid_spec = pltpu.PrefetchScalarGridSpec(
        num_scalar_prefetch=0,
        grid=grid,
        in_specs=[
            pl.BlockSpec((bb, 1, K), lambda b, s: (b, 0, 0)),    # projected query
            pl.BlockSpec((bb, 1, bs), lambda b, s: (b, 0, s)),   # mask
            pl.BlockSpec((bb, bs, K), lambda b, s: (b, s, 0)),   # keys
            pl.BlockSpec((bb, bs, K), lambda b, s: (b, s, 0)),   # values
        ],
        out_specs=[
            pl.BlockSpec((bb, 1, K), lambda b, s: (b, 0, 0)),    # context (resident over S)
            pl.BlockSpec((bb, 1, S), lambda b, s: (b, 0, 0)),    # alphas  (resident over S)
        ],
        scratch_shapes=[
            pltpu.VMEM((bb, 1, 1), jnp.float32),   # running max
            pltpu.VMEM((bb, 1, 1), jnp.float32),   # running denominator
            pltpu.VMEM((bb, 1, K), jnp.float32),   # context numerator
        ],
    )

    out_shape = (
        jax.ShapeDtypeStruct((B, 1, K), values.dtype),
        jax.ShapeDtypeStruct((B, 1, S), jnp.float32),
    )

    context, alphas = pl.pallas_call(
        _luong_attention_kernel,
        grid_spec=grid_spec,
        out_shape=out_shape,
        compiler_params=pltpu.CompilerParams(
            dimension_semantics=("parallel", "arbitrary"),
            vmem_limit_bytes=vmem_limit,
        ),
    )(pq, mask_f, keys_c, vals_c)

    return context, alphas


# --------------------------------------------------------------------------- #
# Pure-JAX reference (original association order) and demo
# --------------------------------------------------------------------------- #
def _reference(query, mask, keys, values, w_key):
    hp = jax.lax.Precision.HIGHEST
    proj_keys = jnp.einsum("bsk,hk->bsh", keys, w_key, precision=hp)
    scores = jnp.einsum("bqh,bsh->bqs", query, proj_keys, precision=hp)
    scores = jnp.where(mask > 0, scores, -jnp.inf)
    alphas = jax.nn.softmax(scores, axis=-1)
    context = jnp.einsum("bqs,bsk->bqk", alphas, values, precision=hp)
    return context, alphas


if __name__ == "__main__":
    B, S, K, H = 4, 128, 128, 64

    key = jax.random.PRNGKey(0)
    k_q, k_k, k_v, k_w = jax.random.split(key, 4)
    query = jax.random.normal(k_q, (B, 1, H), dtype=jnp.float32)
    keys = jax.random.normal(k_k, (B, S, K), dtype=jnp.float32)
    values = jax.random.normal(k_v, (B, S, K), dtype=jnp.float32)
    w_key = jax.random.normal(k_w, (H, K), dtype=jnp.float32) * (1.0 / jnp.sqrt(K))

    mask = jnp.ones((B, 1, S), dtype=jnp.float32)
    mask = mask.at[1, 0, S - 40:].set(0.0)
    mask = mask.at[3, 0, :5].set(0.0)

    # --- f32 path: exact module semantics, tight check ---------------------- #
    context, alphas = luong_attention(query, mask, keys, values, w_key)
    jax.block_until_ready((context, alphas))
    ref_ctx, ref_al = _reference(query, mask, keys, values, w_key)
    assert context.shape == (B, 1, K) and alphas.shape == (B, 1, S)
    assert jnp.allclose(alphas, ref_al, atol=1e-4, rtol=1e-4)
    assert jnp.allclose(context, ref_ctx, atol=1e-4, rtol=1e-4)
    assert jnp.allclose(jnp.sum(alphas, axis=-1), 1.0, atol=1e-5)
    assert float(jnp.max(jnp.abs(alphas[1, 0, S - 40:]))) == 0.0
    assert float(jnp.max(jnp.abs(alphas[3, 0, :5]))) == 0.0

    # --- bf16 streaming path (the main HBM-bandwidth lever) ----------------- #
    ctx_bf, al_bf = luong_attention(query, mask, keys, values, w_key,
                                    compute_dtype=jnp.bfloat16)
    jax.block_until_ready((ctx_bf, al_bf))
    assert ctx_bf.dtype == values.dtype and al_bf.dtype == jnp.float32
    assert jnp.allclose(jnp.sum(al_bf, axis=-1), 1.0, atol=1e-3)
    assert float(jnp.max(jnp.abs(al_bf[1, 0, S - 40:]))) == 0.0
    assert float(jnp.max(jnp.abs(al_bf[3, 0, :5]))) == 0.0
    assert jnp.allclose(al_bf, ref_al, atol=1e-1, rtol=1e-1)
    assert jnp.allclose(ctx_bf, ref_ctx, atol=1.5e-1, rtol=1e-1)

    # --- forced S tiling: exercises the multi-step online-softmax path ------ #
    S2 = 256
    k2_q, k2_k, k2_v = jax.random.split(jax.random.PRNGKey(1), 3)
    query2 = jax.random.normal(k2_q, (B, 1, H), dtype=jnp.float32)
    keys2 = jax.random.normal(k2_k, (B, S2, K), dtype=jnp.float32)
    vals2 = jax.random.normal(k2_v, (B, S2, K), dtype=jnp.float32)
    mask2 = jnp.ones((B, 1, S2), dtype=jnp.float32)
    mask2 = mask2.at[0, 0, 100:].set(0.0)      # second S block fully masked
    mask2 = mask2.at[1, 0, :128].set(0.0)      # first S block fully masked
    mask2 = mask2.at[2, 0, :3].set(0.0)
    ctx2, al2 = luong_attention(query2, mask2, keys2, vals2, w_key, block_s=128)
    jax.block_until_ready((ctx2, al2))
    r_ctx2, r_al2 = _reference(query2, mask2, keys2, vals2, w_key)
    assert jnp.allclose(al2, r_al2, atol=2e-4, rtol=2e-4)
    assert jnp.allclose(ctx2, r_ctx2, atol=2e-4, rtol=2e-4)
    assert jnp.allclose(jnp.sum(al2, axis=-1), 1.0, atol=1e-5)
    assert float(jnp.max(jnp.abs(al2[0, 0, 100:]))) == 0.0
    assert float(jnp.max(jnp.abs(al2[1, 0, :128]))) == 0.0

    print("KERNEL_OK")
</pallas_src>

<mosaic_0001>
module attributes {stable_mosaic.version = 11 : i64} {
  func.func @_luong_attention_kernel(%arg0: i32, %arg1: i32, %arg2: memref<2x1x128xf32, #tpu.memory_space<vmem>>, %arg3: memref<2x1x128xf32, #tpu.memory_space<vmem>>, %arg4: memref<2x128x128xf32, #tpu.memory_space<vmem>>, %arg5: memref<2x128x128xf32, #tpu.memory_space<vmem>>, %arg6: memref<2x1x128xf32, #tpu.memory_space<vmem>>, %arg7: memref<2x1x128xf32, #tpu.memory_space<vmem>>, %arg8: memref<2x1x1xf32, #tpu.memory_space<vmem>>, %arg9: memref<2x1x1xf32, #tpu.memory_space<vmem>>, %arg10: memref<2x1x128xf32, #tpu.memory_space<vmem>>) attributes {dimension_semantics = [#tpu.dimension_semantics<parallel>, #tpu.dimension_semantics<arbitrary>], iteration_bounds = array<i64: 2, 1>, scalar_prefetch = 0 : i64, scratch_operands = 3 : i64, tpu.core_type = #tpu.core_type<tc>, window_params = [{transform_indices = @transform_0, window_bounds = array<i64: 2, 1, 128>}, {transform_indices = @transform_1, window_bounds = array<i64: 2, 1, 128>}, {transform_indices = @transform_2, window_bounds = array<i64: 2, 128, 128>}, {transform_indices = @transform_3, window_bounds = array<i64: 2, 128, 128>}, {transform_indices = @transform_4, window_bounds = array<i64: 2, 1, 128>}, {transform_indices = @transform_5, window_bounds = array<i64: 2, 1, 128>}]} {
    %c0_i32 = arith.constant 0 : i32
    %0 = arith.cmpi eq, %arg1, %c0_i32 : i32
    %1 = arith.extui %0 : i1 to i32
    %c0_i32_0 = arith.constant 0 : i32
    %2 = arith.cmpi ne, %1, %c0_i32_0 : i32
    scf.if %2 {
      %cst_40 = arith.constant -1.000000e+30 : f32
      %38 = vector.broadcast %cst_40 : f32 to vector<2x1x1xf32>
      %c0_41 = arith.constant 0 : index
      %c0_42 = arith.constant 0 : index
      %c0_43 = arith.constant 0 : index
      %39 = vector.load %arg8[%c0_41, %c0_42, %c0_43] : memref<2x1x1xf32, #tpu.memory_space<vmem>>, vector<2x1x1xf32>
      tpu.vector_store %arg8[%c0_41, %c0_42, %c0_43], %38 {strides = array<i32>} : memref<2x1x1xf32, #tpu.memory_space<vmem>>, vector<2x1x1xf32>,
      %cst_44 = arith.constant 0.000000e+00 : f32
      %40 = vector.broadcast %cst_44 : f32 to vector<2x1x1xf32>
      %c0_45 = arith.constant 0 : index
      %c0_46 = arith.constant 0 : index
      %c0_47 = arith.constant 0 : index
      %41 = vector.load %arg9[%c0_45, %c0_46, %c0_47] : memref<2x1x1xf32, #tpu.memory_space<vmem>>, vector<2x1x1xf32>
      tpu.vector_store %arg9[%c0_45, %c0_46, %c0_47], %40 {strides = array<i32>} : memref<2x1x1xf32, #tpu.memory_space<vmem>>, vector<2x1x1xf32>,
      %cst_48 = arith.constant 0.000000e+00 : f32
      %42 = vector.broadcast %cst_48 : f32 to vector<2x1x128xf32>
      %c0_49 = arith.constant 0 : index
      %c0_50 = arith.constant 0 : index
      %c0_51 = arith.constant 0 : index
      %43 = vector.load %arg10[%c0_49, %c0_50, %c0_51] : memref<2x1x128xf32, #tpu.memory_space<vmem>>, vector<2x1x128xf32>
      tpu.vector_store %arg10[%c0_49, %c0_50, %c0_51], %42 {strides = array<i32>} : memref<2x1x128xf32, #tpu.memory_space<vmem>>, vector<2x1x128xf32>,
    } else {
    }
    %c0 = arith.constant 0 : index
    %c0_1 = arith.constant 0 : index
    %c0_2 = arith.constant 0 : index
    %3 = vector.load %arg2[%c0, %c0_1, %c0_2] : memref<2x1x128xf32, #tpu.memory_space<vmem>>, vector<2x1x128xf32>
    %c0_3 = arith.constant 0 : index
    %c0_4 = arith.constant 0 : index
    %c0_5 = arith.constant 0 : index
    %4 = vector.load %arg4[%c0_3, %c0_4, %c0_5] : memref<2x128x128xf32, #tpu.memory_space<vmem>>, vector<2x128x128xf32>
    %c0_6 = arith.constant 0 : index
    %c0_7 = arith.constant 0 : index
    %c0_8 = arith.constant 0 : index
    %5 = vector.load %arg3[%c0_6, %c0_7, %c0_8] : memref<2x1x128xf32, #tpu.memory_space<vmem>>, vector<2x1x128xf32>
    "tpu.trace_start"() <{level = 10 : i32, message = "bqk,bsk->bqs"}> : () -> ()
    %cst = arith.constant dense<0.000000e+00> : vector<2x1x128xf32>
    %6 = tpu.matmul %3, %4, %cst {dimension_numbers = #tpu.dot_dimension_numbers<[2], [2], [1], [1], [0, 0, 0, 1, 1, 1], [0], [0]>} : vector<2x1x128xf32>, vector<2x128x128xf32>, vector<2x1x128xf32> -> vector<2x1x128xf32>
    %cst_9 = arith.constant 0.000000e+00 : f32
    "tpu.trace_stop"() : () -> ()
    %7 = vector.broadcast %cst_9 : f32 to vector<2x1x128xf32>
    %8 = arith.cmpf ogt, %5, %7 : vector<2x1x128xf32>
    %cst_10 = arith.constant 0xFF800000 : f32
    %9 = vector.broadcast %cst_10 : f32 to vector<2x1x128xf32>
    %10 = arith.select %8, %6, %9 : vector<2x1x128xi1>, vector<2x1x128xf32>
    %c0_11 = arith.constant 0 : index
    %c0_12 = arith.constant 0 : index
    %c0_13 = arith.constant 0 : index
    %11 = vector.load %arg8[%c0_11, %c0_12, %c0_13] : memref<2x1x1xf32, #tpu.memory_space<vmem>>, vector<2x1x1xf32>
    %cst_14 = arith.constant dense<0xFF800000> : vector<2x1xf32>
    %12 = vector.multi_reduction <maximumf>, %10, %cst_14 [2] : vector<2x1x128xf32> to vector<2x1xf32>
    %13 = vector.shape_cast %12 : vector<2x1xf32> to vector<2x1x1xf32>
    %14 = arith.maximumf %11, %13 : vector<2x1x1xf32>
    %15 = arith.subf %11, %14 : vector<2x1x1xf32>
    %16 = math.exp %15 : vector<2x1x1xf32>
    %17 = vector.broadcast %14 : vector<2x1x1xf32> to vector<2x1x128xf32>
    %18 = arith.subf %10, %17 : vector<2x1x128xf32>
    %19 = math.exp %18 : vector<2x1x128xf32>
    %c0_15 = arith.constant 0 : index
    %c0_16 = arith.constant 0 : index
    %c0_17 = arith.constant 0 : index
    %20 = vector.load %arg9[%c0_15, %c0_16, %c0_17] : memref<2x1x1xf32, #tpu.memory_space<vmem>>, vector<2x1x1xf32>
    %21 = arith.mulf %16, %20 : vector<2x1x1xf32>
    %cst_18 = arith.constant dense<0.000000e+00> : vector<2x1xf32>
    %22 = vector.multi_reduction <add>, %19, %cst_18 [2] : vector<2x1x128xf32> to vector<2x1xf32>
    %23 = vector.shape_cast %22 : vector<2x1xf32> to vector<2x1x1xf32>
    %24 = arith.addf %21, %23 : vector<2x1x1xf32>
    %c0_19 = arith.constant 0 : index
    %c0_20 = arith.constant 0 : index
    %c0_21 = arith.constant 0 : index
    %25 = vector.load %arg9[%c0_19, %c0_20, %c0_21] : memref<2x1x1xf32, #tpu.memory_space<vmem>>, vector<2x1x1xf32>
    tpu.vector_store %arg9[%c0_19, %c0_20, %c0_21], %24 {strides = array<i32>} : memref<2x1x1xf32, #tpu.memory_space<vmem>>, vector<2x1x1xf32>,
    %c0_22 = arith.constant 0 : index
    %c0_23 = arith.constant 0 : index
    %c0_24 = arith.constant 0 : index
    %26 = vector.load %arg8[%c0_22, %c0_23, %c0_24] : memref<2x1x1xf32, #tpu.memory_space<vmem>>, vector<2x1x1xf32>
    tpu.vector_store %arg8[%c0_22, %c0_23, %c0_24], %14 {strides = array<i32>} : memref<2x1x1xf32, #tpu.memory_space<vmem>>, vector<2x1x1xf32>,
    %c0_25 = arith.constant 0 : index
    %c0_26 = arith.constant 0 : index
    %c0_27 = arith.constant 0 : index
    %27 = vector.load %arg10[%c0_25, %c0_26, %c0_27] : memref<2x1x128xf32, #tpu.memory_space<vmem>>, vector<2x1x128xf32>
    %28 = vector.broadcast %16 : vector<2x1x1xf32> to vector<2x1x128xf32>
    %29 = arith.mulf %28, %27 : vector<2x1x128xf32>
    %c0_28 = arith.constant 0 : index
    %c0_29 = arith.constant 0 : index
    %c0_30 = arith.constant 0 : index
    %30 = vector.load %arg5[%c0_28, %c0_29, %c0_30] : memref<2x128x128xf32, #tpu.memory_space<vmem>>, vector<2x128x128xf32>
    "tpu.trace_start"() <{level = 10 : i32, message = "bqs,bsk->bqk"}> : () -> ()
    %cst_31 = arith.constant dense<0.000000e+00> : vector<2x1x128xf32>
    %31 = tpu.matmul %19, %30, %cst_31 {dimension_numbers = #tpu.dot_dimension_numbers<[2], [1], [1], [2], [0, 0, 0, 1, 1, 2], [0], [0]>} : vector<2x1x128xf32>, vector<2x128x128xf32>, vector<2x1x128xf32> -> vector<2x1x128xf32>
    "tpu.trace_stop"() : () -> ()
    %32 = arith.addf %29, %31 : vector<2x1x128xf32>
    %c0_32 = arith.constant 0 : index
    %c0_33 = arith.constant 0 : index
    %c0_34 = arith.constant 0 : index
    %33 = vector.load %arg10[%c0_32, %c0_33, %c0_34] : memref<2x1x128xf32, #tpu.memory_space<vmem>>, vector<2x1x128xf32>
    tpu.vector_store %arg10[%c0_32, %c0_33, %c0_34], %32 {strides = array<i32>} : memref<2x1x128xf32, #tpu.memory_space<vmem>>, vector<2x1x128xf32>,
    %c0_35 = arith.constant 0 : index
    %c0_36 = arith.constant 0 : index
    %c0_37 = arith.constant 0 : index
    %34 = vector.load %arg7[%c0_35, %c0_36, %c0_37] : memref<2x1x128xf32, #tpu.memory_space<vmem>>, vector<2x1x128xf32>
    tpu.vector_store %arg7[%c0_35, %c0_36, %c0_37], %19 {strides = array<i32>} : memref<2x1x128xf32, #tpu.memory_space<vmem>>, vector<2x1x128xf32>,
    %c0_i32_38 = arith.constant 0 : i32
    %35 = arith.cmpi eq, %arg1, %c0_i32_38 : i32
    %36 = arith.extui %35 : i1 to i32
    %c0_i32_39 = arith.constant 0 : i32
    %37 = arith.cmpi ne, %36, %c0_i32_39 : i32
    scf.if %37 {
      %c0_40 = arith.constant 0 : index
      %c0_41 = arith.constant 0 : index
      %c0_42 = arith.constant 0 : index
      %38 = vector.load %arg9[%c0_40, %c0_41, %c0_42] : memref<2x1x1xf32, #tpu.memory_space<vmem>>, vector<2x1x1xf32>
      %39 = tpu.reciprocal %38 : vector<2x1x1xf32> -> vector<2x1x1xf32>
      %c0_43 = arith.constant 0 : index
      %c0_44 = arith.constant 0 : index
      %c0_45 = arith.constant 0 : index
      %40 = vector.load %arg7[%c0_43, %c0_44, %c0_45] : memref<2x1x128xf32, #tpu.memory_space<vmem>>, vector<2x1x128xf32>
      %41 = vector.broadcast %39 : vector<2x1x1xf32> to vector<2x1x128xf32>
      %42 = arith.mulf %40, %41 : vector<2x1x128xf32>
      %c0_46 = arith.constant 0 : index
      %c0_47 = arith.constant 0 : index
      %c0_48 = arith.constant 0 : index
      %43 = vector.load %arg7[%c0_46, %c0_47, %c0_48] : memref<2x1x128xf32, #tpu.memory_space<vmem>>, vector<2x1x128xf32>
      tpu.vector_store %arg7[%c0_46, %c0_47, %c0_48], %42 {strides = array<i32>} : memref<2x1x128xf32, #tpu.memory_space<vmem>>, vector<2x1x128xf32>,
      %c0_49 = arith.constant 0 : index
      %c0_50 = arith.constant 0 : index
      %c0_51 = arith.constant 0 : index
      %44 = vector.load %arg10[%c0_49, %c0_50, %c0_51] : memref<2x1x128xf32, #tpu.memory_space<vmem>>, vector<2x1x128xf32>
      %45 = vector.broadcast %39 : vector<2x1x1xf32> to vector<2x1x128xf32>
      %46 = arith.mulf %44, %45 : vector<2x1x128xf32>
      %c0_52 = arith.constant 0 : index
      %c0_53 = arith.constant 0 : index
      %c0_54 = arith.constant 0 : index
      %47 = vector.load %arg6[%c0_52, %c0_53, %c0_54] : memref<2x1x128xf32, #tpu.memory_space<vmem>>, vector<2x1x128xf32>
      tpu.vector_store %arg6[%c0_52, %c0_53, %c0_54], %46 {strides = array<i32>} : memref<2x1x128xf32, #tpu.memory_space<vmem>>, vector<2x1x128xf32>,
    } else {
    }
    return
  }
  func.func @transform_0(%arg0: i32, %arg1: i32) -> (i32, i32, i32) {
    %c0_i32 = arith.constant 0 : i32
    %c0_i32_0 = arith.constant 0 : i32
    %c0_i32_1 = arith.constant 0 : i32
    return %arg0, %c0_i32, %c0_i32_0 : i32, i32, i32
  }
  func.func @transform_1(%arg0: i32, %arg1: i32) -> (i32, i32, i32) {
    %c0_i32 = arith.constant 0 : i32
    %c0_i32_0 = arith.constant 0 : i32
    return %arg0, %c0_i32, %arg1 : i32, i32, i32
  }
  func.func @transform_2(%arg0: i32, %arg1: i32) -> (i32, i32, i32) {
    %c0_i32 = arith.constant 0 : i32
    %c0_i32_0 = arith.constant 0 : i32
    return %arg0, %arg1, %c0_i32 : i32, i32, i32
  }
  func.func @transform_3(%arg0: i32, %arg1: i32) -> (i32, i32, i32) {
    %c0_i32 = arith.constant 0 : i32
    %c0_i32_0 = arith.constant 0 : i32
    return %arg0, %arg1, %c0_i32 : i32, i32, i32
  }
  func.func @transform_4(%arg0: i32, %arg1: i32) -> (i32, i32, i32) {
    %c0_i32 = arith.constant 0 : i32
    %c0_i32_0 = arith.constant 0 : i32
    %c0_i32_1 = arith.constant 0 : i32
    return %arg0, %c0_i32, %c0_i32_0 : i32, i32, i32
  }
  func.func @transform_5(%arg0: i32, %arg1: i32) -> (i32, i32, i32) {
    %c0_i32 = arith.constant 0 : i32
    %c0_i32_0 = arith.constant 0 : i32
    %c0_i32_1 = arith.constant 0 : i32
    return %arg0, %c0_i32, %c0_i32_0 : i32, i32, i32
  }
}

</mosaic_0001>

<bundles_post_ra>
// kernel: tpu_custom_call.1
= control target key start
LH: loop header
LB: loop body
LE: loop exit
PB: predicated region body
PF: predicated region fallthrough
CT: control target
= control target key end

     0   :  { %s2218_s0 = inlined_call_operand.hbm [shape: f32[4,1,128], index: 0, kind: input, shape index: {}]   ;;  %s2219_s1 = inlined_call_operand.hbm [shape: f32[4,1,128], index: 1, kind: input, shape index: {}]   ;;  %s2220_s2 = inlined_call_operand.hbm [shape: f32[4,128,128], index: 2, kind: input, shape index: {}]   ;;  %s2221_s3 = inlined_call_operand.hbm [shape: f32[4,128,128], index: 3, kind: input, shape index: {}]   ;;  %s2222_s4 = inlined_call_operand.hbm [shape: f32[4,1,128], index: 4, kind: output, shape index: {0}]   ;;  %s2223_s5 = inlined_call_operand.hbm [shape: f32[4,1,128], index: 5, kind: output, shape index: {1}]  }
   0x1   :  { %2229 = sst [smem:[#allocation26_spill]] %s2218_s0 }
   0x2   :  { %2230 = sst [smem:[#allocation27_spill]] %s2219_s1 }
   0x3   :  { %11 = vsyncpa [#allocation6], 0 }
   0x4   :  { %13 = vsyncpa [#allocation6 + $0x1], 0 }
   0x5   :  { %14 = vsyncpa [#allocation9], 0 }
   0x6   :  { %16 = vsyncpa [#allocation9 + $0x1], 0 }
   0x7   :  { %17 = vsyncpa [#allocation12], 0 }
   0x8   :  { %19 = vsyncpa [#allocation12 + $0x1], 0 }
   0x9   :  { %20 = vsyncpa [#allocation7], 0 }
   0xa   :  { %22 = vsyncpa [#allocation7 + $0x1], 0 }
   0xb   :  { %23 = vsyncpa [#allocation15], 0 }
   0xc   :  { %25 = vsyncpa [#allocation15 + $0x1], 0  ;;  %s1745_s18 = smov 0   ;;  %s1747_s19 = smov 0  }
   0xd   :  { %s1749_s20 = smov 0   ;;  %s1751_s21 = smov 0  }
   0xe   :  { %s1753_s22 = smov 0   ;;  %s1755_s23 = smov 0  }
   0xf LB: > { %2231 = sst [smem:[#allocation21_spill]] %s1685_s20  ;;  %s1776_s24 = sadd.s32 4294967295, %s1697_s23   ;;  %s1697_s23 = sphi %s1755_s23, %s31_s23   ;;  %s1693_s22 = sphi %s1753_s22, %s2253_s22   ;;  %s1689_s21 = sphi %s1751_s21, %s2252_s21   ;;  %s1685_s20 = sphi %s1749_s20, %s2248_s20   ;;  %s1681_s19 = sphi %s1747_s19, %s2251_s19   ;;  %s1677_s18 = sphi %s1745_s18, %s2250_s18  }
  0x10   : > { %2232 = sst [smem:[#allocation22_spill]] %s1697_s23  ;;  %s1113_s25 = sadd.s32 4294967294, %s1697_s23  }
  0x11   : > { %s43_s26 = sadd.s32 1, %s1693_s22  ;;  %s50_s27 = sadd.s32 1, %s1685_s20 }
  0x12   : > { %p45_p0 = scmp.ge.s32.totalorder %s43_s26, 2  ;;  %p57_p1 = scmp.ne.s32.totalorder %s1685_s20, %s1681_s19 }
  0x13   : > { %p58_p2 = scmp.eq.s32.totalorder %s1697_s23, 0  ;;  %p63_p3 = scmp.ne.s32.totalorder %s1681_s19, %s1677_s18 }
  0x14   : > { %s2255_s26 = smov (%p45_p0, %s43_s26), 0  ;;  %p64_p5 = scmp.eq.s32.totalorder %s1776_s24, 0 }
  0x15   : > { %2233 = sst [smem:[#allocation23_spill]] %s2255_s26  ;;  %p1788_p4 = por %p58_p2, %p57_p1 }
  0x16   : > { %s47_s29 = ssub.s32 %s1693_s22, %s2255_s26  ;;  %p171_p6 = scmp.eq.s32.totalorder %s1776_s24, 1 }
  0x17   : > { %p48_p7 = scmp.eq.s32.totalorder %s47_s29, 0  ;;  %p1796_p8 = por %p64_p5, %p63_p3 }
  0x18   : > { %p1800_p9 = por %p171_p6, %p57_p1  ;;  %p177_p10 = scmp.eq.s32.totalorder %s1113_s25, 1 }
  0x19   : > { %s1805_s7 = scalar_select %p48_p7, %s1685_s20, %s50_s27  }
  0x1a   : > { %p1807_p11 = por %p177_p10, %p63_p3  ;;  %p1393_p13 = scmp.lt.s32.totalorder %s1697_s23, 2 }
  0x1b   : > { %2237 = sst [smem:[#allocation24_spill]] %s1805_s7  ;;  %s1814_s9 = sand.u32 1, %s1685_s20  }
  0x1c   : > { %s2238_s8 = scalar_select %p1807_p11, 1, 0 }
  0x1d   : > { %s1116_s10 = sshll.u32 %s1814_s9, 1  ;;  %s1145_s11 = sshll.u32 %s1693_s22, 5 }
  0x1e   : > { %2239 = sst [smem:[#allocation25_spill]] %s2238_s8  ;;  %p1820_p0 = pnand %p1393_p13, %p1788_p4 }
  0x1f   : > { %s244_s13 = sand.u32 1, %s1697_s23   ;;  %s2241_s1 = sld [smem:[#allocation27_spill]] }
  0x20   : > { %s248_s17 = scalar_lea.vmem [#allocation8], %s1116_s10  ;;  %p1130_p1 = scmp.ge.s32.totalorder %s1697_s23, 1 }
  0x21   : > { %s256_s25 = sshll.u32 %s248_s17, 4  ;;  %p312_p2 = scmp.lt.s32.totalorder %s1697_s23, 3  ;;  %s257_s25 = int_to_ptr.vmem [resolvable:$true] %s256_s25 }
  0x22   : > { %s1834_s27 = scalar_lea.sflag [#allocation9], %s244_s13  ;;  %p1469_p3 = pneg %p1820_p0 }
  0x23   : > { %s1480_s28 = scalar_lea.vmem %s257_s25, 32  ;;  %s1699_s29 = smov [#allocation8]  }
  0x24   : > { %p1481_p4 = scmp.ne.s32.totalorder %s257_s25, %s1480_s28  ;;  %s1485_s26 = sshll.u32 %s1699_s29, 4  ;;  %s1486_s26 = int_to_ptr.vmem [resolvable:$false] %s1485_s26 }
  0x25   : > { %s255_s16 = scalar_lea.hbm %s2241_s1, %s1145_s11  ;;  %s1487_s14 = scalar_lea.vmem %s1486_s26, 64 }
  0x26   : > { %p1483_p5 = pnand %p1481_p4, %p1469_p3  ;;  %p1488_p7 = scmp.lt.s32.totalorder %s257_s25, %s1486_s26 }
  0x27   : > { %p1489_p10 = scmp.lt.s32.totalorder %s1487_s14, %s1480_s28 }
  0x28   : > { %p1484_p6 = pneg %p1483_p5 }
  0x29   : > { %p1490_p13 = por %p1489_p10, %p1488_p7 }
  0x2b   : > { %p1491_p12 = pnand %p1490_p13, %p1484_p6 }
  0x2d   : > { %1494 = shalt.err (!%p1491_p12)
}
  0x2e   : > { %s1700_s15 = smov 16   ;;  %s1701_s13 = smov 1  }
  0x2f   : > { %1379 = dma.hbm_to_vmem [thread:$0]  (!%p1820_p0), %s255_s16, 32, %s257_s25, %s1834_s27, %s1700_s15, %s1700_s15, %s1701_s13  }
  0x30   : > { %p1848_p4 = pnand %p1130_p1, %p312_p2  ;;  %s2243_s0 = sld [smem:[#allocation26_spill]] }
  0x31   : > { %s227_s14 = scalar_lea.vmem [#allocation5], %s1116_s10  ;;  %s1122_s7 = sshll.u32 %s1814_s9, 8 }
  0x32   : > { %s234_s1 = sshll.u32 %s227_s14, 4  ;;  %s224_s20 = scalar_lea.sflag [#allocation6], %s1814_s9  ;;  %s235_s1 = int_to_ptr.vmem [resolvable:$true] %s234_s1 }
  0x33   : > { %s1508_s8 = scalar_lea.vmem %s235_s1, 32  ;;  %s1702_s16 = smov [#allocation5]  }
  0x34   : > { %p1509_p12 = scmp.ne.s32.totalorder %s235_s1, %s1508_s8  ;;  %s1513_s25 = sshll.u32 %s1702_s16, 4  ;;  %s1514_s25 = int_to_ptr.vmem [resolvable:$false] %s1513_s25 }
  0x35   : > { %s1515_s23 = scalar_lea.vmem %s1514_s25, 64  ;;  %p1516_p2 = scmp.lt.s32.totalorder %s235_s1, %s1514_s25 }
  0x36   : > { %s233_s29 = scalar_lea.hbm %s2243_s0, %s1145_s11  ;;  %p1511_p5 = pnand %p1509_p12, %p1469_p3 }
  0x37   : > { %p1517_p6 = scmp.lt.s32.totalorder %s1515_s23, %s1508_s8 }
  0x38   : > { %p1512_p1 = pneg %p1511_p5 }
  0x39   : > { %p1518_p7 = por %p1517_p6, %p1516_p2 }
  0x3b   : > { %p1519_p10 = pnand %p1518_p7, %p1512_p1 }
  0x3d   : > { %1522 = shalt.err (!%p1519_p10)
}
  0x3e   : > { %1376 = dma.hbm_to_vmem [thread:$0]  (!%p1820_p0), %s233_s29, 32, %s235_s1, %s224_s20, %s1700_s15, %s1700_s15, %s1701_s13  }
  0x3f   : > { %s1148_s10 = sshll.u32 %s1693_s22, 12  ;;  %s270_s11 = scalar_lea.vmem [#allocation10], %s1122_s7 }
  0x40   : > { %s280_s17 = sshll.u32 %s270_s11, 4  ;;  %s279_s16 = scalar_lea.hbm %s2220_s2, %s1148_s10  ;;  %s281_s17 = int_to_ptr.vmem [resolvable:$true] %s280_s17 }
  0x41   : > { %s1536_s25 = scalar_lea.vmem %s281_s17, 4096  ;;  %s1703_s23 = smov [#allocation10]  }
  0x42   : > { %p1537_p13 = scmp.ne.s32.totalorder %s281_s17, %s1536_s25  ;;  %s1541_s8 = sshll.u32 %s1703_s23, 4  ;;  %s1542_s8 = int_to_ptr.vmem [resolvable:$false] %s1541_s8 }
  0x43   : > { %s1543_s0 = scalar_lea.vmem %s1542_s8, 8192  ;;  %p1544_p1 = scmp.lt.s32.totalorder %s281_s17, %s1542_s8 }
  0x44   : > { %p1539_p12 = pnand %p1537_p13, %p1469_p3  ;;  %p1545_p2 = scmp.lt.s32.totalorder %s1543_s0, %s1536_s25 }
  0x46   : > { %p1540_p5 = pneg %p1539_p12  ;;  %p1546_p6 = por %p1545_p2, %p1544_p1 }
  0x48   : > { %p1547_p7 = pnand %p1546_p6, %p1540_p5 }
  0x4a   : > { %1550 = shalt.err (!%p1547_p7)
}
  0x4b   : > { %s1704_s1 = smov 128   ;;  %s1705_s20 = smov 8  }
  0x4c   : > { %1382 = dma.hbm_to_vmem [thread:$0]  (!%p1820_p0), %s279_s16, 4096, %s281_s17, %s1834_s27, %s1704_s1, %s1704_s1, %s1705_s20  }
  0x4d   : > { %s303_s29 = scalar_lea.hbm %s2221_s3, %s1148_s10  ;;  %s294_s11 = scalar_lea.vmem [#allocation11], %s1122_s7 }
  0x4e   : > { %s304_s28 = sshll.u32 %s294_s11, 4  ;;  %s291_s0 = scalar_lea.sflag [#allocation12], %s1814_s9  ;;  %s305_s28 = int_to_ptr.vmem [resolvable:$true] %s304_s28 }
  0x4f   : > { %s1564_s14 = scalar_lea.vmem %s305_s28, 4096  ;;  %s1706_s25 = smov [#allocation11]  }
  0x50   : > { %p1565_p10 = scmp.ne.s32.totalorder %s305_s28, %s1564_s14  ;;  %s1569_s23 = sshll.u32 %s1706_s25, 4  ;;  %s1570_s23 = int_to_ptr.vmem [resolvable:$false] %s1569_s23 }
  0x51   : > { %s1571_s8 = scalar_lea.vmem %s1570_s23, 8192  ;;  %p1572_p5 = scmp.lt.s32.totalorder %s305_s28, %s1570_s23 }
  0x52   : > { %p1567_p13 = pnand %p1565_p10, %p1469_p3  ;;  %p1573_p1 = scmp.lt.s32.totalorder %s1571_s8, %s1564_s14 }
  0x54   : > { %p1568_p12 = pneg %p1567_p13  ;;  %p1574_p2 = por %p1573_p1, %p1572_p5 }
  0x56   : > { %p1575_p6 = pnand %p1574_p2, %p1568_p12 }
  0x58   : > { %1578 = shalt.err (!%p1575_p6)
}
  0x59   : > { %1385 = dma.hbm_to_vmem [thread:$0]  (!%p1820_p0), %s303_s29, 4096, %s305_s28, %s291_s0, %s1704_s1, %s1704_s1, %s1705_s20  }
  0x5a   : > { %316 = sbr.rel (%p1848_p4) target bundleno = 978 (0x3d2), region = 36  ;;  %s1892_s7 = sand.u32 (!%p1848_p4), 1, %s1681_s19  }
  0x5b   : > { %s1895_s9 = sshll.u32 (!%p1848_p4), %s1892_s7, 1  ;;  %s319_s27 = scalar_lea.sflag (!%p1848_p4), [#allocation6], %s1892_s7 }
  0x5c   : > { %s322_s10 = scalar_lea.vmem (!%p1848_p4), [#allocation5], %s1895_s9 }
  0x5f   : > { %1656 = dma.done.wait (%p1796_p8), %s319_s27, 32  }
  0x60   : > { %1658 = vsyncadd (%p1796_p8), %s319_s27, 4294967264  ;;  %s327_s12 = sand.u32 1, %s1776_s24   ;;  %s331_s17 = scalar_lea.vmem [#allocation8], %s1895_s9 }
  0x61   : > { %s328_s26 = scalar_lea.sflag [#allocation9], %s327_s12 }
  0x62   : > { %1660 = dma.done.wait (%p1796_p8), %s328_s26, 4128  }
  0x63   : > { %1662 = vsyncadd (%p1796_p8), %s328_s26, 4294963168  ;;  %s1133_s16 = sshll.u32 %s1892_s7, 8  ;;  %s346_s20 = scalar_lea.sflag [#allocation12], %s1892_s7 }
  0x64   : > { %s1910_s1 = scalar_lea.vmem [#allocation10], %s1133_s16  ;;  %s1913_s15 = scalar_lea.vmem [#allocation11], %s1133_s16 }
  0x65   : > { %1664 = dma.done.wait (%p1796_p8), %s346_s20, 4096  }
  0x66   : > { %1666 = vsyncadd (%p1796_p8), %s346_s20, 4294963200  ;;  %v1707_v0 = vmov 0.0   ;;  %vm1708_vm0 = vmmov 0   ;;  %v432_v1 = vld [vmem:[%s1910_s1 + $0x78] sm:$0xff]  ;;  %v431_v3 = vld [vmem:[%s1910_s1 + $0x70] sm:$0xff]  ;;  %vm408_vm1 = vcmask 0  }
  0x67   : > { %1221 = vmatprep.subr.mxu0 %v1707_v0  ;;  %413 = vst [vmem:[#allocation4] sm:$0x1] %v1707_v0  ;;  %414 = vst [vmem:[#allocation4 + $0x1] sm:$0x1] %v1707_v0  ;;  %1256 = vmatprep.subr.mxu1 %v1707_v0  ;;  %v448_v2 = vld [vmem:[%s1910_s1 + $0xf8] sm:$0xff]  ;;  %v447_v4 = vld [vmem:[%s1910_s1 + $0xf0] sm:$0xff] }
  0x68   : > { %1253 = vmatprep.mubr.msk.f32.mxu0 %vm1708_vm0, %v1707_v0  ;;  %1288 = vmatprep.mubr.msk.f32.mxu1 %vm1708_vm0, %v1707_v0  ;;  %v430_v5 = vld [vmem:[%s1910_s1 + $0x68] sm:$0xff]  ;;  %v429_v7 = vld [vmem:[%s1910_s1 + $0x60] sm:$0xff]  ;;  %v428_v9 = vld [vmem:[%s1910_s1 + $0x58] sm:$0xff]  ;;  %v1709_v35 = vmov -1e+30   ;;  %vm597_vm4 = vcmask 1040384  }
  0x69   : > { %1222 = vmatpush3.xpose.msra.mxu0 %v432_v1  ;;  %1257 = vmatpush3.xpose.msra.mxu1 %v448_v2  ;;  %v446_v6 = vld [vmem:[%s1910_s1 + $0xe8] sm:$0xff]  ;;  %v445_v8 = vld [vmem:[%s1910_s1 + $0xe0] sm:$0xff]  ;;  %v444_v10 = vld [vmem:[%s1910_s1 + $0xd8] sm:$0xff]  ;;  %409 = vst.msk [vmem:[#allocation2] sm:$0x1] %vm408_vm1, %v1709_v35  ;;  %v1710_v46 = vmov 0  }
  0x6a   : > { %1223 = vmatprep.subr.mxu0 %v1707_v0  ;;  %1258 = vmatprep.subr.mxu1 %v1707_v0  ;;  %v427_v11 = vld [vmem:[%s1910_s1 + $0x50] sm:$0xff]  ;;  %v426_v13 = vld [vmem:[%s1910_s1 + $0x48] sm:$0xff]  ;;  %v425_v15 = vld [vmem:[%s1910_s1 + $0x40] sm:$0xff]  ;;  %410 = vst.msk [vmem:[#allocation2 + $0x1] sm:$0x1] %vm408_vm1, %v1709_v35  ;;  %s2107_s24 = scalar_lea.vmem [#allocation14], %s1895_s9 }
  0x6b   : > { %v443_v12 = vld [vmem:[%s1910_s1 + $0xd0] sm:$0xff]  ;;  %v442_v14 = vld [vmem:[%s1910_s1 + $0xc8] sm:$0xff]  ;;  %v441_v16 = vld [vmem:[%s1910_s1 + $0xc0] sm:$0xff]  ;;  %411 = vst.msk [vmem:[#allocation3] sm:$0x1] %vm408_vm1, %v1707_v0  ;;  %1453 = vset.pattern.permute.xlu1 %v1710_v46  ;;  %1454 = vset.pattern.permute.xlu0 %v1710_v46  ;;  %s388_s30 = scalar_lea.vmem [#allocation13], %s1895_s9 }
  0x6c   : > { %v424_v17 = vld [vmem:[%s1910_s1 + $0x38] sm:$0xff]  ;;  %v423_v19 = vld [vmem:[%s1910_s1 + $0x30] sm:$0xff]  ;;  %v422_v21 = vld [vmem:[%s1910_s1 + $0x28] sm:$0xff]  ;;  %412 = vst.msk [vmem:[#allocation3 + $0x1] sm:$0x1] %vm408_vm1, %v1707_v0  ;;  %s909_s13 = sshll.u32 %s388_s30, 4  ;;  %s2126_s13 = int_to_ptr.vmem [resolvable:$true] %s909_s13 }
  0x6d   : > { %1224 = vmatpush3.xpose.msra.mxu0 %v431_v3  ;;  %1259 = vmatpush3.xpose.msra.mxu1 %v447_v4  ;;  %v440_v18 = vld [vmem:[%s1910_s1 + $0xb8] sm:$0xff]  ;;  %v439_v20 = vld [vmem:[%s1910_s1 + $0xb0] sm:$0xff]  ;;  %v438_v22 = vld [vmem:[%s1910_s1 + $0xa8] sm:$0xff]  ;;  %s1151_s29 = sshll.u32 %s1689_s21, 5  ;;  %s925_s11 = sshll.u32 %s2107_s24, 4  ;;  %s2142_s11 = int_to_ptr.vmem [resolvable:$true] %s925_s11 }
  0x6e   : > { %1225 = vmatprep.subr.mxu0 %v1707_v0  ;;  %1260 = vmatprep.subr.mxu1 %v1707_v0  ;;  %v421_v23 = vld [vmem:[%s1910_s1 + $0x20] sm:$0xff]  ;;  %v420_v25 = vld [vmem:[%s1910_s1 + $0x18] sm:$0xff]  ;;  %v419_v27 = vld [vmem:[%s1910_s1 + $0x10] sm:$0xff]  ;;  %s2135_s14 = scalar_lea.hbm %s2222_s4, %s1151_s29  ;;  %s2140_s23 = scalar_lea.hbm %s2223_s5, %s1151_s29 }
  0x6f   : > { %v437_v24 = vld [vmem:[%s1910_s1 + $0xa0] sm:$0xff]  ;;  %v436_v26 = vld [vmem:[%s1910_s1 + $0x98] sm:$0xff]  ;;  %v435_v28 = vld [vmem:[%s1910_s1 + $0x90] sm:$0xff]  ;;  %s891_s8 = scalar_lea.sflag [#allocation7], %s1892_s7  ;;  %s1579_s9 = scalar_lea.vmem %s2126_s13, 32 }
  0x70   : > { %v418_v29 = vld [vmem:[%s1910_s1 + $0x8] sm:$0xff]  ;;  %v417_v31 = vld [vmem:[%s1910_s1] sm:$0xff]  ;;  %v415_v33 = vld [vmem:[%s322_s10] sm:$0x1]  ;;  %p1580_p8 = scmp.ne.s32.totalorder %s2126_s13, %s1579_s9  ;;  %s1711_s27 = smov [#allocation13]  }
  0x71   : > { %1226 = vmatpush3.xpose.msra.mxu0 %v430_v5  ;;  %1261 = vmatpush3.xpose.msra.mxu1 %v446_v6  ;;  %v434_v30 = vld [vmem:[%s1910_s1 + $0x88] sm:$0xff]  ;;  %v433_v32 = vld [vmem:[%s1910_s1 + $0x80] sm:$0xff]  ;;  %v416_v34 = vld [vmem:[%s322_s10 + $0x1] sm:$0x1]  ;;  %s1583_s10 = sshll.u32 %s1711_s27, 4  ;;  %s1584_s10 = int_to_ptr.vmem [resolvable:$false] %s1583_s10 }
  0x72   : > { %1227 = vmatprep.subr.mxu0 %v1707_v0  ;;  %1262 = vmatprep.subr.mxu1 %v1707_v0  ;;  %v449_v36 = vld [vmem:[%s331_s17] sm:$0x1]  ;;  %v450_v37 = vld [vmem:[%s331_s17 + $0x1] sm:$0x1]  ;;  %v689_v48 = vld [vmem:[%s1913_s15 + $0x70] sm:$0xff]  ;;  %p1581_p0 = pnand %p1580_p8, %p1800_p9  ;;  %s1585_s12 = scalar_lea.vmem %s1584_s10, 64 }
  0x73   : > { %vm591_vm2 = vcmp.gt.f32.partialorder %v449_v36, 0.0  ;;  %vm592_vm3 = vcmp.gt.f32.partialorder %v450_v37, 0.0  ;;  %v690_v47 = vld [vmem:[%s1913_s15 + $0x78] sm:$0xff]  ;;  %v705_v50 = vld [vmem:[%s1913_s15 + $0xf0] sm:$0xff]  ;;  %v688_v51 = vld [vmem:[%s1913_s15 + $0x68] sm:$0xff]  ;;  %p1586_p4 = scmp.lt.s32.totalorder %s2126_s13, %s1584_s10  ;;  %p1587_p7 = scmp.lt.s32.totalorder %s1585_s12, %s1579_s9 }
  0x74   : > { %v706_v49 = vld [vmem:[%s1913_s15 + $0xf8] sm:$0xff]  ;;  %v704_v52 = vld [vmem:[%s1913_s15 + $0xe8] sm:$0xff]  ;;  %v687_v53 = vld [vmem:[%s1913_s15 + $0x60] sm:$0xff]  ;;  %p1582_p3 = pneg %p1581_p0 }
  0x75   : > { %1228 = vmatpush3.xpose.msra.mxu0 %v429_v7  ;;  %1263 = vmatpush3.xpose.msra.mxu1 %v445_v8  ;;  %v703_v54 = vld [vmem:[%s1913_s15 + $0xe0] sm:$0xff]  ;;  %v686_v55 = vld [vmem:[%s1913_s15 + $0x58] sm:$0xff]  ;;  %v685_v56 = vld [vmem:[%s1913_s15 + $0x50] sm:$0xff]  ;;  %p1588_p10 = por %p1587_p7, %p1586_p4 }
  0x76   : > { %1229 = vmatprep.subr.mxu0 %v1707_v0  ;;  %1264 = vmatprep.subr.mxu1 %v1707_v0  ;;  %v2037_v57 = vld [vmem:[#allocation2] sm:$0x1]  ;;  %v684_v58 = vld [vmem:[%s1913_s15 + $0x48] sm:$0xff]  ;;  %v702_v59 = vld [vmem:[%s1913_s15 + $0xd8] sm:$0xff] }
  0x77   : > { %v683_v62 = vld [vmem:[%s1913_s15 + $0x40] sm:$0xff]  ;;  %v701_v63 = vld [vmem:[%s1913_s15 + $0xd0] sm:$0xff]  ;;  %v682_v3 = vld [vmem:[%s1913_s15 + $0x38] sm:$0xff]  ;;  %p1589_p13 = pnand %p1588_p10, %p1582_p3 }
  0x78   : > { %v2048_v1 = vld [vmem:[#allocation2 + $0x1] sm:$0x1]  ;;  %v700_v4 = vld [vmem:[%s1913_s15 + $0xc8] sm:$0xff]  ;;  %v699_v8 = vld [vmem:[%s1913_s15 + $0xc0] sm:$0xff] }
  0x79   : > { %1230 = vmatpush3.xpose.msra.mxu0 %v428_v9  ;;  %1265 = vmatpush3.xpose.msra.mxu1 %v444_v10  ;;  %v681_v7 = vld [vmem:[%s1913_s15 + $0x30] sm:$0xff]  ;;  %v680_v10 = vld [vmem:[%s1913_s15 + $0x28] sm:$0xff] }
  0x7a   : > { %1231 = vmatprep.subr.mxu0 %v1707_v0  ;;  %1266 = vmatprep.subr.mxu1 %v1707_v0 }
  0x7d   : > { %1232 = vmatpush3.xpose.msra.mxu0 %v427_v11  ;;  %1267 = vmatpush3.xpose.msra.mxu1 %v443_v12  ;;  %v698_v11 = vld [vmem:[%s1913_s15 + $0xb8] sm:$0xff]  ;;  %v679_v12 = vld [vmem:[%s1913_s15 + $0x20] sm:$0xff] }
  0x7e   : > { %1233 = vmatprep.subr.mxu0 %v1707_v0  ;;  %1268 = vmatprep.subr.mxu1 %v1707_v0 }
  0x81   : > { %1234 = vmatpush3.xpose.msra.mxu0 %v426_v13  ;;  %1269 = vmatpush3.xpose.msra.mxu1 %v442_v14  ;;  %v697_v13 = vld [vmem:[%s1913_s15 + $0xb0] sm:$0xff]  ;;  %v678_v14 = vld [vmem:[%s1913_s15 + $0x18] sm:$0xff] }
  0x82   : > { %1235 = vmatprep.subr.mxu0 %v1707_v0  ;;  %1270 = vmatprep.subr.mxu1 %v1707_v0 }
  0x85   : > { %1236 = vmatpush3.xpose.msra.mxu0 %v425_v15  ;;  %1271 = vmatpush3.xpose.msra.mxu1 %v441_v16  ;;  %v696_v15 = vld [vmem:[%s1913_s15 + $0xa8] sm:$0xff]  ;;  %v677_v16 = vld [vmem:[%s1913_s15 + $0x10] sm:$0xff] }
  0x86   : > { %1237 = vmatprep.subr.mxu0 %v1707_v0  ;;  %1272 = vmatprep.subr.mxu1 %v1707_v0 }
  0x89   : > { %1238 = vmatpush3.xpose.msra.mxu0 %v424_v17  ;;  %1273 = vmatpush3.xpose.msra.mxu1 %v440_v18  ;;  %v695_v17 = vld [vmem:[%s1913_s15 + $0xa0] sm:$0xff]  ;;  %v676_v18 = vld [vmem:[%s1913_s15 + $0x8] sm:$0xff] }
  0x8a   : > { %1239 = vmatprep.subr.mxu0 %v1707_v0  ;;  %1274 = vmatprep.subr.mxu1 %v1707_v0 }
  0x8d   : > { %1240 = vmatpush3.xpose.msra.mxu0 %v423_v19  ;;  %1275 = vmatpush3.xpose.msra.mxu1 %v439_v20  ;;  %v694_v19 = vld [vmem:[%s1913_s15 + $0x98] sm:$0xff]  ;;  %v675_v20 = vld [vmem:[%s1913_s15] sm:$0xff] }
  0x8e   : > { %1241 = vmatprep.subr.mxu0 %v1707_v0  ;;  %1276 = vmatprep.subr.mxu1 %v1707_v0 }
  0x91   : > { %1242 = vmatpush3.xpose.msra.mxu0 %v422_v21  ;;  %1277 = vmatpush3.xpose.msra.mxu1 %v438_v22  ;;  %v693_v21 = vld [vmem:[%s1913_s15 + $0x90] sm:$0xff]  ;;  %v692_v22 = vld [vmem:[%s1913_s15 + $0x88] sm:$0xff] }
  0x92   : > { %1243 = vmatprep.subr.mxu0 %v1707_v0  ;;  %1278 = vmatprep.subr.mxu1 %v1707_v0 }
  0x95   : > { %1244 = vmatpush3.xpose.msra.mxu0 %v421_v23  ;;  %1279 = vmatpush3.xpose.msra.mxu1 %v437_v24  ;;  %v691_v23 = vld [vmem:[%s1913_s15 + $0x80] sm:$0xff]  ;;  %v617_v24 = vlaneseq }
  0x96   : > { %1245 = vmatprep.subr.mxu0 %v1707_v0  ;;  %1280 = vmatprep.subr.mxu1 %v1707_v0 }
  0x99   : > { %1246 = vmatpush3.xpose.msra.mxu0 %v420_v25  ;;  %1281 = vmatpush3.xpose.msra.mxu1 %v436_v26  ;;  %v618_v25 = vshrl.u32 %v617_v24, 7 }
  0x9a   : > { %1247 = vmatprep.subr.mxu0 %v1707_v0  ;;  %1282 = vmatprep.subr.mxu1 %v1707_v0 }
  0x9b   : > { %v2099_v26 = vsub.s32 0, %v618_v25 }
  0x9d   : > { %1248 = vmatpush3.xpose.msra.mxu0 %v419_v27  ;;  %1283 = vmatpush3.xpose.msra.mxu1 %v435_v28 }
  0x9e   : > { %1249 = vmatprep.subr.mxu0 %v1707_v0  ;;  %1284 = vmatprep.subr.mxu1 %v1707_v0 }
  0xa1   : > { %1250 = vmatpush3.xpose.msra.mxu0 %v418_v29  ;;  %1285 = vmatpush3.xpose.msra.mxu1 %v434_v30 }
  0xa2   : > { %1251 = vmatprep.subr.mxu0 %v1707_v0  ;;  %1286 = vmatprep.subr.mxu1 %v1707_v0 }
  0xa5   : > { %1252 = vmatpush3.xpose.msra.mxu0 %v417_v31  ;;  %1287 = vmatpush3.xpose.msra.mxu1 %v433_v32 }
  0xa6   : > { %1291 = vmatprep.subr.mxu0 %v1707_v0  ;;  %1326 = vmatprep.subr.mxu1 %v1707_v0 }
  0xa8   : > { %1254 = vmatmul.mubr.f32.vlgmr.msra.gmra.mxu0 %v415_v33  ;;  %1289 = vmatmul.mubr.f32.vlgmr.msra.gmra.mxu1 %v416_v34 }
  0xa9   : > { %1323 = vmatprep.mubr.msk.f32.mxu0 %vm1708_vm0, %v1707_v0  ;;  %1358 = vmatprep.mubr.msk.f32.mxu1 %vm1708_vm0, %v1707_v0 }
  0xaa   : > { %1292 = vmatpush3.msra.mxu0 %v690_v47  ;;  %1327 = vmatpush3.msra.mxu1 %v706_v49 }
  0xab   : > { %1293 = vmatprep.subr.mxu0 %v1707_v0  ;;  %1328 = vmatprep.subr.mxu1 %v1707_v0 }
  0xac   : > { %1294 = vmatpush3.msra.mxu0 %v689_v48  ;;  %1329 = vmatpush3.msra.mxu1 %v705_v50 }
  0xad   : > { %1295 = vmatprep.subr.mxu0 %v1707_v0  ;;  %1330 = vmatprep.subr.mxu1 %v1707_v0 }
  0xae   : > { %1296 = vmatpush3.msra.mxu0 %v688_v51  ;;  %1331 = vmatpush3.msra.mxu1 %v704_v52 }
  0xaf   : > { %1297 = vmatprep.subr.mxu0 %v1707_v0  ;;  %1332 = vmatprep.subr.mxu1 %v1707_v0 }
  0xb0   : > { %1298 = vmatpush3.msra.mxu0 %v687_v53  ;;  %1333 = vmatpush3.msra.mxu1 %v703_v54 }
  0xb1   : > { %1299 = vmatprep.subr.mxu0 %v1707_v0  ;;  %1334 = vmatprep.subr.mxu1 %v1707_v0 }
  0xb2   : > { %1300 = vmatpush3.msra.mxu0 %v686_v55  ;;  %1335 = vmatpush3.msra.mxu1 %v702_v59 }
  0xb3   : > { %1301 = vmatprep.subr.mxu0 %v1707_v0  ;;  %1336 = vmatprep.subr.mxu1 %v1707_v0 }
  0xb4   : > { %1302 = vmatpush3.msra.mxu0 %v685_v56  ;;  %1337 = vmatpush3.msra.mxu1 %v701_v63 }
  0xb5   : > { %1303 = vmatprep.subr.mxu0 %v1707_v0  ;;  %1338 = vmatprep.subr.mxu1 %v1707_v0 }
  0xb6   : > { %1304 = vmatpush3.msra.mxu0 %v684_v58  ;;  %1339 = vmatpush3.msra.mxu1 %v700_v4 }
  0xb7   : > { %1305 = vmatprep.subr.mxu0 %v1707_v0  ;;  %1340 = vmatprep.subr.mxu1 %v1707_v0 }
  0xb8   : > { %1306 = vmatpush3.msra.mxu0 %v683_v62  ;;  %1341 = vmatpush3.msra.mxu1 %v699_v8 }
  0xb9   : > { %1307 = vmatprep.subr.mxu0 %v1707_v0  ;;  %1342 = vmatprep.subr.mxu1 %v1707_v0 }
  0xba   : > { %1308 = vmatpush3.msra.mxu0 %v682_v3  ;;  %1343 = vmatpush3.msra.mxu1 %v698_v11 }
  0xbb   : > { %1309 = vmatprep.subr.mxu0 %v1707_v0  ;;  %1344 = vmatprep.subr.mxu1 %v1707_v0 }
  0xbc   : > { %1310 = vmatpush3.msra.mxu0 %v681_v7  ;;  %1345 = vmatpush3.msra.mxu1 %v697_v13 }
  0xbd   : > { %1311 = vmatprep.subr.mxu0 %v1707_v0  ;;  %1346 = vmatprep.subr.mxu1 %v1707_v0 }
  0xbe   : > { %1312 = vmatpush3.msra.mxu0 %v680_v10  ;;  %1347 = vmatpush3.msra.mxu1 %v696_v15 }
  0xbf   : > { %1313 = vmatprep.subr.mxu0 %v1707_v0  ;;  %1348 = vmatprep.subr.mxu1 %v1707_v0 }
  0xc0   : > { %1314 = vmatpush3.msra.mxu0 %v679_v12  ;;  %1349 = vmatpush3.msra.mxu1 %v695_v17 }
  0xc1   : > { %1315 = vmatprep.subr.mxu0 %v1707_v0  ;;  %1350 = vmatprep.subr.mxu1 %v1707_v0 }
  0xc2   : > { %1316 = vmatpush3.msra.mxu0 %v678_v14  ;;  %1351 = vmatpush3.msra.mxu1 %v694_v19 }
  0xc3   : > { %1317 = vmatprep.subr.mxu0 %v1707_v0  ;;  %1352 = vmatprep.subr.mxu1 %v1707_v0 }
  0xc4   : > { %1318 = vmatpush3.msra.mxu0 %v677_v16  ;;  %1353 = vmatpush3.msra.mxu1 %v693_v21 }
  0xc5   : > { %1319 = vmatprep.subr.mxu0 %v1707_v0  ;;  %1354 = vmatprep.subr.mxu1 %v1707_v0 }
  0xc6   : > { %1320 = vmatpush3.msra.mxu0 %v676_v18  ;;  %1355 = vmatpush3.msra.mxu1 %v692_v22 }
  0xc7   : > { %1321 = vmatprep.subr.mxu0 %v1707_v0  ;;  %1356 = vmatprep.subr.mxu1 %v1707_v0 }
  0xc8   : > { %1322 = vmatpush3.msra.mxu0 %v675_v20  ;;  %1357 = vmatpush3.msra.mxu1 %v691_v23 }
 0x168   : > { %v517_v38 = vpop.f32.mrf.mxu0  ;;  %v587_v39 = vpop.f32.mrf.mxu1 }
 0x169   : > { %v2009_v40 = vsel %vm591_vm2, %v517_v38, -inf  ;;  %v2011_v41 = vsel %vm592_vm3, %v587_v39, -inf }
 0x16a   : > { %v1255_v42 = vpop.f32.mrf.mxu0  ;;  %v598_v43 = vsel %vm597_vm4, %v2009_v40, -inf  ;;  %v1290_v44 = vpop.f32.mrf.mxu1  ;;  %v601_v45 = vsel %vm597_vm4, %v2011_v41, -inf }
 0x16b   : > { %599 = vmax.xlane.f32.xlu0 %v598_v43  ;;  %v636_v42 = vld [vmem:[#allocation3] sm:$0x1] }
 0x16f   : > { %602 = vmax.xlane.f32.xlu0 %v601_v45  ;;  %v637_v45 = vld [vmem:[#allocation3 + $0x1] sm:$0x1] }
 0x1f4   : > { %v600_v60 = vpop.xlane.xlu0 %599 }
 0x1f5   : > { %v2042_v61 = vmax.f32 %v2037_v57, %v600_v60 }
 0x1f7   : > { %v606_v2 = vsub.f32 %v2037_v57, %v2042_v61  ;;  %651 = vst.msk [vmem:[#allocation2] sm:$0x1] %vm408_vm1, %v2042_v61  ;;  %614 = vperm.xlu1 %1453, %v2042_v61   ;;  %v653_v57 = vld [vmem:[#allocation4] sm:$0x1]  ;;  %v654_v61 = vld [vmem:[#allocation4 + $0x1] sm:$0x1] }
 0x1f8   : > { %v603_v5 = vpop.xlane.xlu0 %602 }
 0x1f9   : > { %v2060_v6 = vmax.f32 %v2048_v1, %v603_v5  ;;  %v608_v39 = vmul.f32 1.442695, %v606_v2 }
 0x1fb   : > { %v607_v9 = vsub.f32 %v2048_v1, %v2060_v6  ;;  %652 = vst.msk [vmem:[#allocation2 + $0x1] sm:$0x1] %vm408_vm1, %v2060_v6  ;;  %623 = vperm.xlu1 %1453, %v2060_v6  }
 0x1fd   : > { %v610_v37 = vmul.f32 1.442695, %v607_v9 }
 0x272   : > { %v615_v27 = vpop.permute.xlu1 %614 }
 0x273   : > { %v620_v28 = vrot.slane %v615_v27, %v2099_v26 }
 0x275   : > { %v630_v29 = vsub.f32 %v2009_v40, %v620_v28 }
 0x276   : > { %v624_v30 = vpop.permute.xlu1 %623 }
 0x277   : > { %v632_v31 = vmul.f32 1.442695, %v630_v29  ;;  %v629_v32 = vrot.slane %v624_v30, %v2099_v26 }
 0x279   : > { %1455 = vpow2.f32 %v632_v31  ;;  %v631_v33 = vsub.f32 %v2011_v41, %v629_v32 }
 0x27b   : > { %v634_v34 = vmul.f32 1.442695, %v631_v33 }
 0x27d   : > { %1457 = vpow2.f32 %v634_v34 }
 0x27e   : > { %1459 = vpow2.f32 %v610_v37 }
 0x27f   : > { %1461 = vpow2.f32 %v608_v39 }
 0x286   : > { %v1456_v0 = vpop.eup %1455 }
 0x287   : > { %1324 = vmatmul.mubr.f32.vlgmr.msra.gmra.mxu0 %v1456_v0  ;;  %v640_v35 = vsel %vm597_vm4, %v1456_v0, 0.0  ;;  %851 = vst [vmem:[%s2107_s24] sm:$0x1] %v1456_v0 }
 0x288   : > { %641 = vadd.xlane.f32.xlu0 %v640_v35 }
 0x28a   : > { %v1458_v36 = vpop.eup %1457 }
 0x28b   : > { %1359 = vmatmul.mubr.f32.vlgmr.msra.gmra.mxu1 %v1458_v36  ;;  %v643_v38 = vsel %vm597_vm4, %v1458_v36, 0.0  ;;  %852 = vst [vmem:[%s2107_s24 + $0x1] sm:$0x1] %v1458_v36  ;;  %v1460_v40 = vpop.eup %1459 }
 0x28c   : > { %644 = vadd.xlane.f32.xlu1 %v643_v38  ;;  %v1462_v41 = vpop.eup %1461  ;;  %v639_v47 = vmul.f32 %v1460_v40, %v637_v45 }
 0x28d   : > { %v638_v43 = vmul.f32 %v1462_v41, %v636_v42 }
 0x28e   : > { %v860_v7 = vld [vmem:[%s2107_s24] sm:$0x1] }
 0x292   : > { %v861_v13 = vld [vmem:[%s2107_s24 + $0x1] sm:$0x1] }
 0x29d   : > { %666 = vperm.xlu1 %1453, %v1460_v40  }
 0x29e   : > { %657 = vperm.xlu0 %1454, %v1462_v41  }
 0x311   : > { %v642_v44 = vpop.xlane.xlu0 %641 }
 0x312   : > { %v646_v46 = vadd.f32 %v642_v44, %v638_v43 }
 0x314   : > { %649 = vst.msk [vmem:[#allocation3] sm:$0x1] %vm408_vm1, %v646_v46 }
 0x315   : > { %v645_v48 = vpop.xlane.xlu1 %644 }
 0x316   : > { %v647_v49 = vadd.f32 %v645_v48, %v639_v47 }
 0x318   : > { %650 = vst.msk [vmem:[#allocation3 + $0x1] sm:$0x1] %vm408_vm1, %v647_v49 }
 0x319   : > { %v658_v54 = vpop.permute.xlu0 %657  ;;  %v667_v56 = vpop.permute.xlu1 %666 }
 0x31a   : > { %v663_v55 = vrot.slane %v658_v54, %v2099_v26  ;;  %v672_v58 = vrot.slane %v667_v56, %v2099_v26 }
 0x31b   : > { %v856_v50 = vld [vmem:[#allocation3] sm:$0x1] }
 0x31c   : > { %1463 = vrcp.f32 %v856_v50  ;;  %v673_v59 = vmul.f32 %v663_v55, %v653_v57  ;;  %v674_v1 = vmul.f32 %v672_v58, %v654_v61 }
 0x31f   : > { %v857_v51 = vld [vmem:[#allocation3 + $0x1] sm:$0x1] }
 0x320   : > { %1465 = vrcp.f32 %v857_v51 }
 0x329   : > { %v1464_v52 = vpop.eup %1463 }
 0x32a   : > { %864 = vperm.xlu0 %1454, %v1464_v52  }
 0x32d   : > { %v1466_v53 = vpop.eup %1465 }
 0x32e   : > { %873 = vperm.xlu0 %1454, %v1466_v53  }
 0x347   : > { %v773_v60 = vpop.f32.mrf.mxu0 }
 0x348   : > { %v847_v62 = vadd.f32 %v773_v60, %v673_v59 }
 0x349   : > { %v1325_v63 = vpop.f32.mrf.mxu0 }
 0x34a   : > { %849 = vst [vmem:[#allocation4] sm:$0x1] %v847_v62 }
 0x34b   : > { %v843_v2 = vpop.f32.mrf.mxu1 }
 0x34c   : > { %v848_v3 = vadd.f32 %v843_v2, %v674_v1 }
 0x34d   : > { %v1360_v4 = vpop.f32.mrf.mxu1 }
 0x34e   : > { %850 = vst [vmem:[#allocation4 + $0x1] sm:$0x1] %v848_v3 }
 0x351   : > { %v884_v8 = vld [vmem:[#allocation4] sm:$0x1] }
 0x355   : > { %v885_v14 = vld [vmem:[#allocation4 + $0x1] sm:$0x1] }
 0x3a5   : > { %v865_v5 = vpop.permute.xlu0 %864 }
 0x3a6   : > { %v870_v6 = vrot.slane %v865_v5, %v2099_v26 }
 0x3a8   : > { %v880_v9 = vmul.f32 %v870_v6, %v860_v7  ;;  %v886_v10 = vmul.f32 %v884_v8, %v870_v6 }
 0x3a9   : > { %v874_v11 = vpop.permute.xlu0 %873 }
 0x3aa   : > { %882 = vst [vmem:[%s2107_s24] sm:$0x1] %v880_v9  ;;  %888 = vst [vmem:[%s388_s30] sm:$0x1] %v886_v10  ;;  %v879_v12 = vrot.slane %v874_v11, %v2099_v26 }
 0x3ac   : > { %v881_v15 = vmul.f32 %v879_v12, %v861_v13  ;;  %v887_v16 = vmul.f32 %v885_v14, %v879_v12 }
 0x3ae   : > { %883 = vst [vmem:[%s2107_s24 + $0x1] sm:$0x1] %v881_v15  ;;  %889 = vst [vmem:[%s388_s30 + $0x1] sm:$0x1] %v887_v16 }
 0x3af   : > { %1592 = shalt.err (!%p1589_p13)
}
 0x3b0   : > { %s1593_s26 = scalar_lea.hbm %s2135_s14, 32  ;;  %s1597_s1 = scalar_lea.hbm %s2222_s4, 64 }
 0x3b1   : > { %p1594_p12 = scmp.ne.s32.totalorder %s2135_s14, %s1593_s26  ;;  %p1598_p2 = scmp.lt.s32.totalorder %s2135_s14, %s2222_s4 }
 0x3b2   : > { %p1599_p6 = scmp.lt.s32.totalorder %s1597_s1, %s1593_s26 }
 0x3b3   : > { %p1595_p5 = pnand %p1594_p12, %p1800_p9 }
 0x3b4   : > { %p1600_p8 = por %p1599_p6, %p1598_p2 }
 0x3b5   : > { %p1596_p1 = pneg %p1595_p5 }
 0x3b7   : > { %p1601_p0 = pnand %p1600_p8, %p1596_p1 }
 0x3b9   : > { %1604 = shalt.err (!%p1601_p0)
}
 0x3ba   : > { %s1712_s24 = smov 16   ;;  %s1713_s30 = smov 1  }
 0x3bb   : > { %1369 = dma.vmem_to_hbm [thread:$0]  (%p1800_p9), %s2126_s13, 32, %s2135_s14, %s891_s8, %s1712_s24, %s1712_s24, %s1713_s30  }
 0x3bc   : > { %s896_s29 = scalar_lea.sflag [#allocation15], %s1892_s7  ;;  %s1605_s28 = scalar_lea.vmem %s2142_s11, 32 }
 0x3bd   : > { %p1606_p3 = scmp.ne.s32.totalorder %s2142_s11, %s1605_s28  ;;  %s1714_s0 = smov [#allocation14]  }
 0x3be   : > { %s1609_s21 = sshll.u32 %s1714_s0, 4  ;;  %s1610_s21 = int_to_ptr.vmem [resolvable:$false] %s1609_s21 }
 0x3bf   : > { %p1607_p4 = pnand %p1606_p3, %p1800_p9  ;;  %s1611_s25 = scalar_lea.vmem %s1610_s21, 64 }
 0x3c0   : > { %p1612_p10 = scmp.lt.s32.totalorder %s2142_s11, %s1610_s21  ;;  %p1613_p13 = scmp.lt.s32.totalorder %s1611_s25, %s1605_s28 }
 0x3c1   : > { %p1608_p7 = pneg %p1607_p4 }
 0x3c2   : > { %p1614_p12 = por %p1613_p13, %p1612_p10 }
 0x3c4   : > { %p1615_p5 = pnand %p1614_p12, %p1608_p7 }
 0x3c6   : > { %1618 = shalt.err (!%p1615_p5)
}
 0x3c7   : > { %s1619_s13 = scalar_lea.hbm %s2140_s23, 32  ;;  %s1623_s8 = scalar_lea.hbm %s2223_s5, 64 }
 0x3c8   : > { %p1620_p1 = scmp.ne.s32.totalorder %s2140_s23, %s1619_s13  ;;  %p1624_p8 = scmp.lt.s32.totalorder %s2140_s23, %s2223_s5 }
 0x3c9   : > { %p1625_p0 = scmp.lt.s32.totalorder %s1623_s8, %s1619_s13 }
 0x3ca   : > { %p1621_p2 = pnand %p1620_p1, %p1800_p9 }
 0x3cb   : > { %p1626_p3 = por %p1625_p0, %p1624_p8 }
 0x3cc   : > { %p1622_p6 = pneg %p1621_p2 }
 0x3ce   : > { %p1627_p4 = pnand %p1626_p3, %p1622_p6 }
 0x3d0   : > { %1630 = shalt.err (!%p1627_p4)
}
 0x3d1   : > { %1370 = dma.vmem_to_hbm [thread:$0]  (%p1800_p9), %s2142_s11, 32, %s2140_s23, %s896_s29, %s1712_s24, %s1712_s24, %s1713_s30  }
 0x3d2 PF: > { %s2245_s12 = sld [smem:[#allocation22_spill]]  ;;  %s940_s26 = sand.u32 1, %s1677_s18  }
 0x3d3   : > { %s941_s17 = scalar_lea.sflag [#allocation7], %s940_s26 }
 0x3d8   : > { %p2246_p7 = scmp.ge.s32.totalorder %s2245_s12, 2 }
 0x3da   : > { %p1387_p10 = pnand %p2246_p7, %p1807_p11 }
 0x3dc   : > { %p1388_p13 = pneg %p1387_p10 }
 0x3de   : > { %1668 = dma.done.wait (%p1388_p13), %s941_s17, 32  }
 0x3df   : > { %1670 = vsyncadd (%p1388_p13), %s941_s17, 4294967264  ;;  %s950_s16 = scalar_lea.sflag [#allocation15], %s940_s26 }
 0x3e0   : > { %1672 = dma.done.wait (%p1388_p13), %s950_s16, 32  }
 0x3e1   : > { %1674 = vsyncadd (%p1388_p13), %s950_s16, 4294967264  ;;  %s31_s23 = sadd.s32 1, %s2245_s12   ;;  %s2247_s6 = sld [smem:[#allocation21_spill]] }
 0x3e2   : > { %p28_p12 = scmp.ge.s32.totalorder %s31_s23, 4   ;;  %s2248_s20 = sld [smem:[#allocation24_spill]] }
 0x3e3   : > { %s2249_s11 = sld [smem:[#allocation23_spill]]  ;;  %s2250_s18 = smov %s1681_s19 }
 0x3e4   : > { %s2252_s21 = smov %s1693_s22 }
 0x3e5   :  { %30 = sbr.rel (!%p28_p12) target bundleno = 15 (0xf), region = 143 }
 0x3e7   : > { %s2251_s19 = smov %s2247_s6 }
 0x3e9   : > { %s2253_s22 = smov %s2249_s11 }
 0x3ea   :  { %955 = vsyncpa [#allocation6], 1 }
 0x3eb   :  { %957 = vsyncpa [#allocation6 + $0x1], 1 }
 0x3ec   :  { %958 = vsyncpa [#allocation9], 1 }
 0x3ed   :  { %960 = vsyncpa [#allocation9 + $0x1], 1 }
 0x3ee   :  { %961 = vsyncpa [#allocation12], 1 }
 0x3ef   :  { %963 = vsyncpa [#allocation12 + $0x1], 1 }
 0x3f0   :  { %964 = vsyncpa [#allocation7], 1 }
 0x3f1   :  { %966 = vsyncpa [#allocation7 + $0x1], 1 }
 0x3f2   :  { %967 = vsyncpa [#allocation15], 1 }
 0x3f3   :  { %969 = vsyncpa [#allocation15 + $0x1], 1 }

</bundles_post_ra>
